<compile_context>
chip_gen: v5e
topology: v5e:2x2
jax: 0.10.0
libtpu: 0.0.40
codegen_flags: <defaults>
</compile_context>

<pallas_src>
import functools

import jax
import jax.numpy as jnp
from jax.experimental import pallas as pl
from jax.experimental.pallas import tpu as pltpu

IMG_SIZE = 28 * 28     # 784, fixed by the module
D_PAD = 896            # 7 * 128 : lane-dense padding of the 784-feature dim


def _round_up(x, m):
    return (x + m - 1) // m * m


# ---------------------------------------------------------------- kernel -----
def vae_kernel(x_ref, eps_ref,
               w1_ref, b1_ref, wh_ref, bh_ref, wd_ref, bd_ref, wo_ref, bo_ref,
               recon_ref, mu_ref, logvar_ref, *, n):
    # ---- encoder: h1 = tanh(x @ W1 + b1) -----------------------------------
    h1 = jnp.tanh(
        jnp.dot(x_ref[...], w1_ref[...], preferred_element_type=jnp.float32)
        + b1_ref[...]
    )                                                           # (TB, h)

    # ---- merged mu/logvar heads: one (h, 2n) matmul ------------------------
    heads = (
        jnp.dot(h1, wh_ref[...], preferred_element_type=jnp.float32)
        + bh_ref[...]
    )                                                           # (TB, 2n)
    mu = heads[:, :n]
    logvar = heads[:, n:]
    mu_ref[...] = mu
    logvar_ref[...] = logvar

    # ---- reparameterization: z = mu + eps * exp(0.5 * logvar) --------------
    z = mu + eps_ref[...] * jnp.exp(0.5 * logvar)               # (TB, n)

    # ---- decoder: sigmoid(tanh(z @ Wd + bd) @ Wo + bo) ----------------------
    h2 = jnp.tanh(
        jnp.dot(z, wd_ref[...], preferred_element_type=jnp.float32) + bd_ref[...]
    )                                                           # (TB, h)
    logits = (
        jnp.dot(h2, wo_ref[...], preferred_element_type=jnp.float32) + bo_ref[...]
    )                                                           # (TB, D_PAD)
    recon_ref[...] = jax.nn.sigmoid(logits)


# ---------------------------------------------------------------- wrapper ----
def vae_forward(x, params, eps, *, block_b=512):
    """Equivalent of VAE.forward(x) -> (recon, mu, logvar). eps ~ N(0,1), (B, n)."""
    w1, b1, wmu, bmu, wlv, blv, wd, bd, wo, bo = params
    h = w1.shape[1]
    n = wmu.shape[1]

    x_flat = x.reshape(-1, IMG_SIZE).astype(jnp.float32)        # x.view(-1, 784)
    B = x_flat.shape[0]

    # Batch tile: multiple of 8 (sublane alignment); 512 rows keeps the
    # double-buffered x/recon tiles (~7 MiB total) well under scoped VMEM on
    # v5e / v6e / v7x.  TODO(synk): for large-batch v6e runs, cast activations/
    # weights to bf16 and raise TB / vmem_limit_bytes for more HBM-BW headroom.
    TB = min(_round_up(B, 8), block_b)
    B_pad = _round_up(B, TB)

    # Lane-dense zero-padding 784 -> 896 (and batch -> B_pad).
    x_p = jnp.zeros((B_pad, D_PAD), jnp.float32).at[:B, :IMG_SIZE].set(x_flat)
    eps_p = jnp.zeros((B_pad, n), jnp.float32).at[:B].set(eps.astype(jnp.float32))
    w1_p = jnp.zeros((D_PAD, h), jnp.float32).at[:IMG_SIZE].set(w1)
    wo_p = jnp.zeros((h, D_PAD), jnp.float32).at[:, :IMG_SIZE].set(wo)
    bo_p = jnp.zeros((1, D_PAD), jnp.float32).at[:, :IMG_SIZE].set(bo)

    # Merge mu / logvar heads into one weight matrix (h, 2n) + bias (1, 2n).
    wh = jnp.concatenate([wmu, wlv], axis=1)
    bh = jnp.concatenate([bmu, blv], axis=1)

    resident = lambda i: (0, 0)   # weights/biases: same block every step -> no re-DMA

    recon_p, mu_p, logvar_p = pl.pallas_call(
        functools.partial(vae_kernel, n=n),
        out_shape=(
            jax.ShapeDtypeStruct((B_pad, D_PAD), jnp.float32),
            jax.ShapeDtypeStruct((B_pad, n), jnp.float32),
            jax.ShapeDtypeStruct((B_pad, n), jnp.float32),
        ),
        grid=(B_pad // TB,),
        in_specs=[
            pl.BlockSpec((TB, D_PAD), lambda i: (i, 0)),   # x (padded)
            pl.BlockSpec((TB, n), lambda i: (i, 0)),       # eps
            pl.BlockSpec((D_PAD, h), resident),            # W_enc
            pl.BlockSpec((1, h), resident),                # b_enc
            pl.BlockSpec((h, 2 * n), resident),            # W_heads (mu|logvar)
            pl.BlockSpec((1, 2 * n), resident),            # b_heads
            pl.BlockSpec((n, h), resident),                # W_dec
            pl.BlockSpec((1, h), resident),                # b_dec
            pl.BlockSpec((h, D_PAD), resident),            # W_out (padded)
            pl.BlockSpec((1, D_PAD), resident),            # b_out (padded)
        ],
        out_specs=(
            pl.BlockSpec((TB, D_PAD), lambda i: (i, 0)),   # recon (padded)
            pl.BlockSpec((TB, n), lambda i: (i, 0)),       # mu
            pl.BlockSpec((TB, n), lambda i: (i, 0)),       # logvar
        ),
        compiler_params=pltpu.CompilerParams(
            dimension_semantics=("parallel",),
        ),
    )(x_p, eps_p, w1_p, b1, wh, bh, wd, bd, wo_p, bo_p)

    return recon_p[:B, :IMG_SIZE], mu_p[:B], logvar_p[:B]


# -------------------------------------------------------- reference / init ---
def vae_reference(x, params, eps):
    """Plain-JAX reference of the same forward pass (for correctness checks)."""
    w1, b1, wmu, bmu, wlv, blv, wd, bd, wo, bo = params
    xf = x.reshape(-1, IMG_SIZE).astype(jnp.float32)
    h1 = jnp.tanh(xf @ w1 + b1)
    mu = h1 @ wmu + bmu
    logvar = h1 @ wlv + blv
    z = mu + eps * jnp.exp(0.5 * logvar)     # == mu + eps * sqrt(exp(logvar))
    h2 = jnp.tanh(z @ wd + bd)
    recon = jax.nn.sigmoid(h2 @ wo + bo)
    return recon, mu, logvar


def init_params(key, h, n):
    """Deterministic synthetic init; weights stored as (in, out), biases (1, out)."""
    ks = jax.random.split(key, 10)

    def dense(kw, kb, fan_in, fan_out):
        scale = 1.0 / jnp.sqrt(jnp.float32(fan_in))
        w = jax.random.uniform(kw, (fan_in, fan_out), jnp.float32, -scale, scale)
        b = jax.random.uniform(kb, (1, fan_out), jnp.float32, -scale, scale)
        return w, b

    w1, b1 = dense(ks[0], ks[1], IMG_SIZE, h)   # h_encoder
    wmu, bmu = dense(ks[2], ks[3], h, n)        # h_mu
    wlv, blv = dense(ks[4], ks[5], h, n)        # h_logvar
    wd, bd = dense(ks[6], ks[7], n, h)          # h_decoder
    wo, bo = dense(ks[8], ks[9], h, IMG_SIZE)   # output
    return (w1, b1, wmu, bmu, wlv, blv, wd, bd, wo, bo)


# -------------------------------------------------------------------- main ---
if __name__ == "__main__":
    h, n = 32, 8          # VAE(h=32, n=8)
    B = 8                 # small batch

    root = jax.random.PRNGKey(0)
    k_params, k_x, k_eps = jax.random.split(root, 3)

    params = init_params(k_params, h, n)
    # MNIST-like input: (B, 1, 28, 28) in [0, 1); forward flattens it.
    x = jax.random.uniform(k_x, (B, 1, 28, 28), jnp.float32)
    # eps ~ N(0,1), same shape as (mu, logvar) rows (matches torch.randn_like).
    eps = jax.random.normal(k_eps, (B, n), jnp.float32)

    fwd = jax.jit(vae_forward)
    recon, mu, logvar = fwd(x, params, eps)
    jax.block_until_ready((recon, mu, logvar))

    # Shape / range / correctness checks against the plain-JAX reference.
    r_ref, mu_ref, lv_ref = vae_reference(x, params, eps)
    assert recon.shape == (B, IMG_SIZE)
    assert mu.shape == (B, n) and logvar.shape == (B, n)
    assert bool(jnp.all(jnp.isfinite(recon)))
    assert bool(jnp.all((recon >= 0.0) & (recon <= 1.0)))
    assert bool(jnp.allclose(recon, r_ref, atol=1e-5, rtol=1e-5))
    assert bool(jnp.allclose(mu, mu_ref, atol=1e-5, rtol=1e-5))
    assert bool(jnp.allclose(logvar, lv_ref, atol=1e-5, rtol=1e-5))

    print("KERNEL_OK")
</pallas_src>

<mosaic_0001>
module attributes {stable_mosaic.version = 11 : i64} {
  func.func @vae_kernel(%arg0: i32, %arg1: memref<8x896xf32, #tpu.memory_space<vmem>>, %arg2: memref<8x8xf32, #tpu.memory_space<vmem>>, %arg3: memref<896x32xf32, #tpu.memory_space<vmem>>, %arg4: memref<1x32xf32, #tpu.memory_space<vmem>>, %arg5: memref<32x16xf32, #tpu.memory_space<vmem>>, %arg6: memref<1x16xf32, #tpu.memory_space<vmem>>, %arg7: memref<8x32xf32, #tpu.memory_space<vmem>>, %arg8: memref<1x32xf32, #tpu.memory_space<vmem>>, %arg9: memref<32x896xf32, #tpu.memory_space<vmem>>, %arg10: memref<1x896xf32, #tpu.memory_space<vmem>>, %arg11: memref<8x896xf32, #tpu.memory_space<vmem>>, %arg12: memref<8x8xf32, #tpu.memory_space<vmem>>, %arg13: memref<8x8xf32, #tpu.memory_space<vmem>>) attributes {dimension_semantics = [#tpu.dimension_semantics<parallel>], iteration_bounds = array<i64: 1>, scalar_prefetch = 0 : i64, scratch_operands = 0 : i64, tpu.core_type = #tpu.core_type<tc>, window_params = [{transform_indices = @transform_0, window_bounds = array<i64: 8, 896>}, {transform_indices = @transform_1, window_bounds = array<i64: 8, 8>}, {pipeline_mode = #tpu.pipeline_mode<synchronous>, transform_indices = @transform_2, window_bounds = array<i64: 896, 32>}, {pipeline_mode = #tpu.pipeline_mode<synchronous>, transform_indices = @transform_3, window_bounds = array<i64: 1, 32>}, {pipeline_mode = #tpu.pipeline_mode<synchronous>, transform_indices = @transform_4, window_bounds = array<i64: 32, 16>}, {pipeline_mode = #tpu.pipeline_mode<synchronous>, transform_indices = @transform_5, window_bounds = array<i64: 1, 16>}, {pipeline_mode = #tpu.pipeline_mode<synchronous>, transform_indices = @transform_6, window_bounds = array<i64: 8, 32>}, {pipeline_mode = #tpu.pipeline_mode<synchronous>, transform_indices = @transform_7, window_bounds = array<i64: 1, 32>}, {pipeline_mode = #tpu.pipeline_mode<synchronous>, transform_indices = @transform_8, window_bounds = array<i64: 32, 896>}, {pipeline_mode = #tpu.pipeline_mode<synchronous>, transform_indices = @transform_9, window_bounds = array<i64: 1, 896>}, {transform_indices = @transform_10, window_bounds = array<i64: 8, 896>}, {transform_indices = @transform_11, window_bounds = array<i64: 8, 8>}, {transform_indices = @transform_12, window_bounds = array<i64: 8, 8>}]} {
    %c0 = arith.constant 0 : index
    %c0_0 = arith.constant 0 : index
    %0 = vector.load %arg1[%c0, %c0_0] : memref<8x896xf32, #tpu.memory_space<vmem>>, vector<8x896xf32>
    %c0_1 = arith.constant 0 : index
    %c0_2 = arith.constant 0 : index
    %1 = vector.load %arg3[%c0_1, %c0_2] : memref<896x32xf32, #tpu.memory_space<vmem>>, vector<896x32xf32>
    %cst = arith.constant dense<0.000000e+00> : vector<8x32xf32>
    %2 = tpu.matmul %0, %1, %cst {dimension_numbers = #tpu.dot_dimension_numbers<[1], [0], [0], [1], [0, 0, 1, 1], [], []>} : vector<8x896xf32>, vector<896x32xf32>, vector<8x32xf32> -> vector<8x32xf32>
    %c0_3 = arith.constant 0 : index
    %c0_4 = arith.constant 0 : index
    %3 = vector.load %arg4[%c0_3, %c0_4] : memref<1x32xf32, #tpu.memory_space<vmem>>, vector<1x32xf32>
    %4 = vector.broadcast %3 : vector<1x32xf32> to vector<8x32xf32>
    %5 = arith.addf %2, %4 : vector<8x32xf32>
    %6 = math.tanh %5 : vector<8x32xf32>
    %c0_5 = arith.constant 0 : index
    %c0_6 = arith.constant 0 : index
    %7 = vector.load %arg5[%c0_5, %c0_6] : memref<32x16xf32, #tpu.memory_space<vmem>>, vector<32x16xf32>
    %cst_7 = arith.constant dense<0.000000e+00> : vector<8x16xf32>
    %8 = tpu.matmul %6, %7, %cst_7 {dimension_numbers = #tpu.dot_dimension_numbers<[1], [0], [0], [1], [0, 0, 1, 1], [], []>} : vector<8x32xf32>, vector<32x16xf32>, vector<8x16xf32> -> vector<8x16xf32>
    %c0_8 = arith.constant 0 : index
    %c0_9 = arith.constant 0 : index
    %9 = vector.load %arg6[%c0_8, %c0_9] : memref<1x16xf32, #tpu.memory_space<vmem>>, vector<1x16xf32>
    %10 = vector.broadcast %9 : vector<1x16xf32> to vector<8x16xf32>
    %11 = arith.addf %8, %10 : vector<8x16xf32>
    %12 = vector.extract_strided_slice %11 {offsets = [0, 0], sizes = [8, 8], strides = [1, 1]} : vector<8x16xf32> to vector<8x8xf32>
    %13 = vector.extract_strided_slice %11 {offsets = [0, 8], sizes = [8, 8], strides = [1, 1]} : vector<8x16xf32> to vector<8x8xf32>
    %c0_10 = arith.constant 0 : index
    %c0_11 = arith.constant 0 : index
    %14 = vector.load %arg12[%c0_10, %c0_11] : memref<8x8xf32, #tpu.memory_space<vmem>>, vector<8x8xf32>
    tpu.vector_store %arg12[%c0_10, %c0_11], %12 {strides = array<i32>} : memref<8x8xf32, #tpu.memory_space<vmem>>, vector<8x8xf32>,
    %c0_12 = arith.constant 0 : index
    %c0_13 = arith.constant 0 : index
    %15 = vector.load %arg13[%c0_12, %c0_13] : memref<8x8xf32, #tpu.memory_space<vmem>>, vector<8x8xf32>
    tpu.vector_store %arg13[%c0_12, %c0_13], %13 {strides = array<i32>} : memref<8x8xf32, #tpu.memory_space<vmem>>, vector<8x8xf32>,
    %c0_14 = arith.constant 0 : index
    %c0_15 = arith.constant 0 : index
    %16 = vector.load %arg2[%c0_14, %c0_15] : memref<8x8xf32, #tpu.memory_space<vmem>>, vector<8x8xf32>
    %cst_16 = arith.constant 5.000000e-01 : f32
    %17 = vector.broadcast %cst_16 : f32 to vector<8x8xf32>
    %18 = arith.mulf %17, %13 : vector<8x8xf32>
    %19 = math.exp %18 : vector<8x8xf32>
    %20 = arith.mulf %16, %19 : vector<8x8xf32>
    %21 = arith.addf %12, %20 : vector<8x8xf32>
    %c0_17 = arith.constant 0 : index
    %c0_18 = arith.constant 0 : index
    %22 = vector.load %arg7[%c0_17, %c0_18] : memref<8x32xf32, #tpu.memory_space<vmem>>, vector<8x32xf32>
    %cst_19 = arith.constant dense<0.000000e+00> : vector<8x32xf32>
    %23 = tpu.matmul %21, %22, %cst_19 {dimension_numbers = #tpu.dot_dimension_numbers<[1], [0], [0], [1], [0, 0, 1, 1], [], []>} : vector<8x8xf32>, vector<8x32xf32>, vector<8x32xf32> -> vector<8x32xf32>
    %c0_20 = arith.constant 0 : index
    %c0_21 = arith.constant 0 : index
    %24 = vector.load %arg8[%c0_20, %c0_21] : memref<1x32xf32, #tpu.memory_space<vmem>>, vector<1x32xf32>
    %25 = vector.broadcast %24 : vector<1x32xf32> to vector<8x32xf32>
    %26 = arith.addf %23, %25 : vector<8x32xf32>
    %27 = math.tanh %26 : vector<8x32xf32>
    %c0_22 = arith.constant 0 : index
    %c0_23 = arith.constant 0 : index
    %28 = vector.load %arg9[%c0_22, %c0_23] : memref<32x896xf32, #tpu.memory_space<vmem>>, vector<32x896xf32>
    %cst_24 = arith.constant dense<0.000000e+00> : vector<8x896xf32>
    %29 = tpu.matmul %27, %28, %cst_24 {dimension_numbers = #tpu.dot_dimension_numbers<[1], [0], [0], [1], [0, 0, 1, 1], [], []>} : vector<8x32xf32>, vector<32x896xf32>, vector<8x896xf32> -> vector<8x896xf32>
    %c0_25 = arith.constant 0 : index
    %c0_26 = arith.constant 0 : index
    %30 = vector.load %arg10[%c0_25, %c0_26] : memref<1x896xf32, #tpu.memory_space<vmem>>, vector<1x896xf32>
    %31 = vector.broadcast %30 : vector<1x896xf32> to vector<8x896xf32>
    %32 = arith.addf %29, %31 : vector<8x896xf32>
    %33 = arith.negf %32 : vector<8x896xf32>
    %34 = math.exp %33 : vector<8x896xf32>
    %cst_27 = arith.constant 1.000000e+00 : f32
    %35 = vector.broadcast %cst_27 : f32 to vector<8x896xf32>
    %36 = arith.addf %35, %34 : vector<8x896xf32>
    %37 = arith.divf %35, %36 : vector<8x896xf32>
    %c0_28 = arith.constant 0 : index
    %c0_29 = arith.constant 0 : index
    %38 = vector.load %arg11[%c0_28, %c0_29] : memref<8x896xf32, #tpu.memory_space<vmem>>, vector<8x896xf32>
    tpu.vector_store %arg11[%c0_28, %c0_29], %37 {strides = array<i32>} : memref<8x896xf32, #tpu.memory_space<vmem>>, vector<8x896xf32>,
    return
  }
  func.func @transform_0(%arg0: i32) -> (i32, i32) {
    %c0_i32 = arith.constant 0 : i32
    %c0_i32_0 = arith.constant 0 : i32
    return %arg0, %c0_i32 : i32, i32
  }
  func.func @transform_1(%arg0: i32) -> (i32, i32) {
    %c0_i32 = arith.constant 0 : i32
    %c0_i32_0 = arith.constant 0 : i32
    return %arg0, %c0_i32 : i32, i32
  }
  func.func @transform_2(%arg0: i32) -> (i32, i32) {
    %c0_i32 = arith.constant 0 : i32
    %c0_i32_0 = arith.constant 0 : i32
    %c0_i32_1 = arith.constant 0 : i32
    return %c0_i32, %c0_i32_0 : i32, i32
  }
  func.func @transform_3(%arg0: i32) -> (i32, i32) {
    %c0_i32 = arith.constant 0 : i32
    %c0_i32_0 = arith.constant 0 : i32
    %c0_i32_1 = arith.constant 0 : i32
    return %c0_i32, %c0_i32_0 : i32, i32
  }
  func.func @transform_4(%arg0: i32) -> (i32, i32) {
    %c0_i32 = arith.constant 0 : i32
    %c0_i32_0 = arith.constant 0 : i32
    %c0_i32_1 = arith.constant 0 : i32
    return %c0_i32, %c0_i32_0 : i32, i32
  }
  func.func @transform_5(%arg0: i32) -> (i32, i32) {
    %c0_i32 = arith.constant 0 : i32
    %c0_i32_0 = arith.constant 0 : i32
    %c0_i32_1 = arith.constant 0 : i32
    return %c0_i32, %c0_i32_0 : i32, i32
  }
  func.func @transform_6(%arg0: i32) -> (i32, i32) {
    %c0_i32 = arith.constant 0 : i32
    %c0_i32_0 = arith.constant 0 : i32
    %c0_i32_1 = arith.constant 0 : i32
    return %c0_i32, %c0_i32_0 : i32, i32
  }
  func.func @transform_7(%arg0: i32) -> (i32, i32) {
    %c0_i32 = arith.constant 0 : i32
    %c0_i32_0 = arith.constant 0 : i32
    %c0_i32_1 = arith.constant 0 : i32
    return %c0_i32, %c0_i32_0 : i32, i32
  }
  func.func @transform_8(%arg0: i32) -> (i32, i32) {
    %c0_i32 = arith.constant 0 : i32
    %c0_i32_0 = arith.constant 0 : i32
    %c0_i32_1 = arith.constant 0 : i32
    return %c0_i32, %c0_i32_0 : i32, i32
  }
  func.func @transform_9(%arg0: i32) -> (i32, i32) {
    %c0_i32 = arith.constant 0 : i32
    %c0_i32_0 = arith.constant 0 : i32
    %c0_i32_1 = arith.constant 0 : i32
    return %c0_i32, %c0_i32_0 : i32, i32
  }
  func.func @transform_10(%arg0: i32) -> (i32, i32) {
    %c0_i32 = arith.constant 0 : i32
    %c0_i32_0 = arith.constant 0 : i32
    return %arg0, %c0_i32 : i32, i32
  }
  func.func @transform_11(%arg0: i32) -> (i32, i32) {
    %c0_i32 = arith.constant 0 : i32
    %c0_i32_0 = arith.constant 0 : i32
    return %arg0, %c0_i32 : i32, i32
  }
  func.func @transform_12(%arg0: i32) -> (i32, i32) {
    %c0_i32 = arith.constant 0 : i32
    %c0_i32_0 = arith.constant 0 : i32
    return %arg0, %c0_i32 : i32, i32
  }
}

</mosaic_0001>

<bundles_post_ra>
// kernel: vae_forward.1
= control target key start
LH: loop header
LB: loop body
LE: loop exit
PB: predicated region body
PF: predicated region fallthrough
CT: control target
= control target key end

     0   :  { %18 = vsyncpa [#allocation3], 0  ;;  %s1484_s0 = inlined_call_operand.vmem [shape: f32[8,896], index: 0, kind: input, shape index: {}]   ;;  %s1485_s1 = inlined_call_operand.vmem [shape: f32[8,8], index: 1, kind: input, shape index: {}]   ;;  %s1486_s2 = inlined_call_operand.vmem [shape: f32[896,32], index: 2, kind: input, shape index: {}]   ;;  %s1487_s3 = inlined_call_operand.vmem [shape: f32[1,32], index: 3, kind: input, shape index: {}]   ;;  %s1488_s4 = inlined_call_operand.vmem [shape: f32[32,16], index: 4, kind: input, shape index: {}]   ;;  %s1489_s5 = inlined_call_operand.vmem [shape: f32[1,16], index: 5, kind: input, shape index: {}]   ;;  %s1490_s6 = inlined_call_operand.vmem [shape: f32[8,32], index: 6, kind: input, shape index: {}]   ;;  %s1491_s7 = inlined_call_operand.vmem [shape: f32[1,32], index: 7, kind: input, shape index: {}]   ;;  %s1492_s8 = inlined_call_operand.vmem [shape: f32[32,896], index: 8, kind: input, shape index: {}]   ;;  %s1493_s9 = inlined_call_operand.vmem [shape: f32[1,896], index: 9, kind: input, shape index: {}]   ;;  %s1494_s10 = inlined_call_operand.hbm [shape: f32[8,896], index: 10, kind: output, shape index: {0}]   ;;  %s1495_s11 = inlined_call_operand.hbm [shape: f32[8,8], index: 11, kind: output, shape index: {1}]   ;;  %s1496_s12 = inlined_call_operand.hbm [shape: f32[8,8], index: 12, kind: output, shape index: {2}]  }
   0x1   :  { %v94_v0 = vld [vmem:[%s1486_s2 + $0x178] sm:$0xff]  ;;  %v93_v2 = vld [vmem:[%s1486_s2 + $0x170] sm:$0xff]  ;;  %v92_v5 = vld [vmem:[%s1486_s2 + $0x168] sm:$0xff] }
   0x2   :  { %v62_v1 = vld [vmem:[%s1486_s2 + $0x78] sm:$0xff]  ;;  %203 = vmatpush.msra.mxu2 %v94_v0  ;;  %v61_v3 = vld [vmem:[%s1486_s2 + $0x70] sm:$0xff]  ;;  %v60_v6 = vld [vmem:[%s1486_s2 + $0x68] sm:$0xff] }
   0x3   :  { %163 = vmatpush.msra.mxu0 %v62_v1  ;;  %v78_v4 = vld [vmem:[%s1486_s2 + $0xf8] sm:$0xff]  ;;  %v77_v7 = vld [vmem:[%s1486_s2 + $0xf0] sm:$0xff]  ;;  %v76_v8 = vld [vmem:[%s1486_s2 + $0xe8] sm:$0xff] }
   0x4   :  { %183 = vmatpush.msra.mxu1 %v78_v4  ;;  %204 = vmatpush.msra.mxu2 %v93_v2  ;;  %v91_v9 = vld [vmem:[%s1486_s2 + $0x160] sm:$0xff]  ;;  %v90_v12 = vld [vmem:[%s1486_s2 + $0x158] sm:$0xff]  ;;  %v89_v15 = vld [vmem:[%s1486_s2 + $0x150] sm:$0xff] }
   0x5   :  { %164 = vmatpush.msra.mxu0 %v61_v3  ;;  %v59_v10 = vld [vmem:[%s1486_s2 + $0x60] sm:$0xff]  ;;  %v58_v13 = vld [vmem:[%s1486_s2 + $0x58] sm:$0xff]  ;;  %v57_v16 = vld [vmem:[%s1486_s2 + $0x50] sm:$0xff] }
   0x6   :  { %184 = vmatpush.msra.mxu1 %v77_v7  ;;  %205 = vmatpush.msra.mxu2 %v92_v5  ;;  %v75_v11 = vld [vmem:[%s1486_s2 + $0xe0] sm:$0xff]  ;;  %v74_v14 = vld [vmem:[%s1486_s2 + $0xd8] sm:$0xff]  ;;  %v73_v17 = vld [vmem:[%s1486_s2 + $0xd0] sm:$0xff] }
   0x7   :  { %165 = vmatpush.msra.mxu0 %v60_v6  ;;  %v88_v18 = vld [vmem:[%s1486_s2 + $0x148] sm:$0xff]  ;;  %v87_v21 = vld [vmem:[%s1486_s2 + $0x140] sm:$0xff]  ;;  %v110_v23 = vld [vmem:[%s1486_s2 + $0x1f8] sm:$0xff] }
   0x8   :  { %185 = vmatpush.msra.mxu1 %v76_v8  ;;  %206 = vmatpush.msra.mxu2 %v91_v9  ;;  %v56_v19 = vld [vmem:[%s1486_s2 + $0x48] sm:$0xff]  ;;  %v55_v22 = vld [vmem:[%s1486_s2 + $0x40] sm:$0xff]  ;;  %v109_v25 = vld [vmem:[%s1486_s2 + $0x1f0] sm:$0xff] }
   0x9   :  { %166 = vmatpush.msra.mxu0 %v59_v10  ;;  %v72_v20 = vld [vmem:[%s1486_s2 + $0xc8] sm:$0xff]  ;;  %v71_v24 = vld [vmem:[%s1486_s2 + $0xc0] sm:$0xff]  ;;  %v86_v26 = vld [vmem:[%s1486_s2 + $0x138] sm:$0xff]  ;;  %223 = vmatpush.msra.mxu3 %v110_v23 }
   0xa   :  { %186 = vmatpush.msra.mxu1 %v75_v11  ;;  %207 = vmatpush.msra.mxu2 %v90_v12  ;;  %v54_v27 = vld [vmem:[%s1486_s2 + $0x38] sm:$0xff]  ;;  %v108_v29 = vld [vmem:[%s1486_s2 + $0x1e8] sm:$0xff]  ;;  %v85_v30 = vld [vmem:[%s1486_s2 + $0x130] sm:$0xff] }
   0xb   :  { %167 = vmatpush.msra.mxu0 %v58_v13  ;;  %v70_v28 = vld [vmem:[%s1486_s2 + $0xb8] sm:$0xff]  ;;  %v53_v31 = vld [vmem:[%s1486_s2 + $0x30] sm:$0xff]  ;;  %224 = vmatpush.msra.mxu3 %v109_v25  ;;  %v107_v33 = vld [vmem:[%s1486_s2 + $0x1e0] sm:$0xff] }
   0xc   :  { %187 = vmatpush.msra.mxu1 %v74_v14  ;;  %208 = vmatpush.msra.mxu2 %v89_v15  ;;  %v69_v32 = vld [vmem:[%s1486_s2 + $0xb0] sm:$0xff]  ;;  %v84_v34 = vld [vmem:[%s1486_s2 + $0x128] sm:$0xff]  ;;  %v106_v37 = vld [vmem:[%s1486_s2 + $0x1d8] sm:$0xff] }
   0xd   :  { %168 = vmatpush.msra.mxu0 %v57_v16  ;;  %v52_v35 = vld [vmem:[%s1486_s2 + $0x28] sm:$0xff]  ;;  %225 = vmatpush.msra.mxu3 %v108_v29  ;;  %v83_v38 = vld [vmem:[%s1486_s2 + $0x120] sm:$0xff]  ;;  %v105_v41 = vld [vmem:[%s1486_s2 + $0x1d0] sm:$0xff] }
   0xe   :  { %188 = vmatpush.msra.mxu1 %v73_v17  ;;  %209 = vmatpush.msra.mxu2 %v88_v18  ;;  %v68_v36 = vld [vmem:[%s1486_s2 + $0xa8] sm:$0xff]  ;;  %v51_v39 = vld [vmem:[%s1486_s2 + $0x20] sm:$0xff]  ;;  %v82_v42 = vld [vmem:[%s1486_s2 + $0x118] sm:$0xff] }
   0xf   :  { %169 = vmatpush.msra.mxu0 %v56_v19  ;;  %226 = vmatpush.msra.mxu3 %v107_v33  ;;  %v67_v40 = vld [vmem:[%s1486_s2 + $0xa0] sm:$0xff]  ;;  %v50_v43 = vld [vmem:[%s1486_s2 + $0x18] sm:$0xff]  ;;  %v104_v45 = vld [vmem:[%s1486_s2 + $0x1c8] sm:$0xff] }
  0x10   :  { %189 = vmatpush.msra.mxu1 %v72_v20  ;;  %210 = vmatpush.msra.mxu2 %v87_v21  ;;  %v66_v44 = vld [vmem:[%s1486_s2 + $0x98] sm:$0xff]  ;;  %v81_v46 = vld [vmem:[%s1486_s2 + $0x110] sm:$0xff]  ;;  %v103_v49 = vld [vmem:[%s1486_s2 + $0x1c0] sm:$0xff] }
  0x11   :  { %170 = vmatpush.msra.mxu0 %v55_v22  ;;  %227 = vmatpush.msra.mxu3 %v106_v37  ;;  %v49_v47 = vld [vmem:[%s1486_s2 + $0x10] sm:$0xff]  ;;  %v80_v50 = vld [vmem:[%s1486_s2 + $0x108] sm:$0xff]  ;;  %v102_v53 = vld [vmem:[%s1486_s2 + $0x1b8] sm:$0xff] }
  0x12   :  { %190 = vmatpush.msra.mxu1 %v71_v24  ;;  %211 = vmatpush.msra.mxu2 %v86_v26  ;;  %v65_v48 = vld [vmem:[%s1486_s2 + $0x90] sm:$0xff]  ;;  %v48_v51 = vld [vmem:[%s1486_s2 + $0x8] sm:$0xff]  ;;  %v79_v54 = vld [vmem:[%s1486_s2 + $0x100] sm:$0xff] }
  0x13   :  { %171 = vmatpush.msra.mxu0 %v54_v27  ;;  %228 = vmatpush.msra.mxu3 %v105_v41  ;;  %v64_v52 = vld [vmem:[%s1486_s2 + $0x88] sm:$0xff]  ;;  %v47_v55 = vld [vmem:[%s1486_s2] sm:$0xff]  ;;  %v158_v56 = vld [vmem:[%s1486_s2 + $0x378] sm:$0xff] }
  0x14   :  { %191 = vmatpush.msra.mxu1 %v70_v28  ;;  %212 = vmatpush.msra.mxu2 %v85_v30  ;;  %v126_v57 = vld [vmem:[%s1486_s2 + $0x278] sm:$0xff]  ;;  %v63_v58 = vld [vmem:[%s1486_s2 + $0x80] sm:$0xff]  ;;  %v101_v59 = vld [vmem:[%s1486_s2 + $0x1b0] sm:$0xff] }
  0x15   :  { %172 = vmatpush.msra.mxu0 %v53_v31  ;;  %229 = vmatpush.msra.mxu3 %v104_v45  ;;  %v157_v60 = vld [vmem:[%s1486_s2 + $0x370] sm:$0xff]  ;;  %v142_v62 = vld [vmem:[%s1486_s2 + $0x2f8] sm:$0xff]  ;;  %v100_v63 = vld [vmem:[%s1486_s2 + $0x1a8] sm:$0xff] }
  0x16   :  { %192 = vmatpush.msra.mxu1 %v69_v32  ;;  %213 = vmatpush.msra.mxu2 %v84_v34  ;;  %v125_v61 = vld [vmem:[%s1486_s2 + $0x270] sm:$0xff]  ;;  %v156_v0 = vld [vmem:[%s1486_s2 + $0x368] sm:$0xff]  ;;  %v99_v3 = vld [vmem:[%s1486_s2 + $0x1a0] sm:$0xff] }
  0x17   :  { %173 = vmatpush.msra.mxu0 %v52_v35  ;;  %230 = vmatpush.msra.mxu3 %v103_v49  ;;  %v124_v1 = vld [vmem:[%s1486_s2 + $0x268] sm:$0xff]  ;;  %v141_v2 = vld [vmem:[%s1486_s2 + $0x2f0] sm:$0xff]  ;;  %v155_v4 = vld [vmem:[%s1486_s2 + $0x360] sm:$0xff] }
  0x18   :  { %193 = vmatpush.msra.mxu1 %v68_v36  ;;  %214 = vmatpush.msra.mxu2 %v83_v38  ;;  %v123_v5 = vld [vmem:[%s1486_s2 + $0x260] sm:$0xff]  ;;  %v140_v6 = vld [vmem:[%s1486_s2 + $0x2e8] sm:$0xff]  ;;  %v98_v7 = vld [vmem:[%s1486_s2 + $0x198] sm:$0xff] }
  0x19   :  { %174 = vmatpush.msra.mxu0 %v51_v39  ;;  %231 = vmatpush.msra.mxu3 %v102_v53  ;;  %v154_v8 = vld [vmem:[%s1486_s2 + $0x358] sm:$0xff]  ;;  %v139_v10 = vld [vmem:[%s1486_s2 + $0x2e0] sm:$0xff]  ;;  %v153_v11 = vld [vmem:[%s1486_s2 + $0x350] sm:$0xff] }
  0x1a   :  { %194 = vmatpush.msra.mxu1 %v67_v40  ;;  %215 = vmatpush.msra.mxu2 %v82_v42  ;;  %v122_v9 = vld [vmem:[%s1486_s2 + $0x258] sm:$0xff]  ;;  %v97_v12 = vld [vmem:[%s1486_s2 + $0x190] sm:$0xff]  ;;  %v96_v15 = vld [vmem:[%s1486_s2 + $0x188] sm:$0xff] }
  0x1b   :  { %175 = vmatpush.msra.mxu0 %v50_v43  ;;  %232 = vmatpush.msra.mxu3 %v101_v59  ;;  %v121_v13 = vld [vmem:[%s1486_s2 + $0x250] sm:$0xff]  ;;  %v138_v14 = vld [vmem:[%s1486_s2 + $0x2d8] sm:$0xff]  ;;  %v152_v16 = vld [vmem:[%s1486_s2 + $0x348] sm:$0xff] }
  0x1c   :  { %195 = vmatpush.msra.mxu1 %v66_v44  ;;  %216 = vmatpush.msra.mxu2 %v81_v46  ;;  %v120_v17 = vld [vmem:[%s1486_s2 + $0x248] sm:$0xff] }
  0x1d   :  { %176 = vmatpush.msra.mxu0 %v49_v47  ;;  %233 = vmatpush.msra.mxu3 %v100_v63 }
  0x1e   :  { %196 = vmatpush.msra.mxu1 %v65_v48  ;;  %217 = vmatpush.msra.mxu2 %v80_v50 }
  0x1f   :  { %177 = vmatpush.msra.mxu0 %v48_v51  ;;  %234 = vmatpush.msra.mxu3 %v99_v3 }
  0x20   :  { %197 = vmatpush.msra.mxu1 %v64_v52  ;;  %218 = vmatpush.msra.mxu2 %v79_v54 }
  0x21   :  { %178 = vmatpush.msra.mxu0 %v47_v55  ;;  %235 = vmatpush.msra.mxu3 %v98_v7 }
  0x22   :  { %283 = vmatpush.msrb.mxu2 %v158_v56  ;;  %198 = vmatpush.msra.mxu1 %v63_v58 }
  0x23   :  { %243 = vmatpush.msrb.mxu0 %v126_v57  ;;  %236 = vmatpush.msra.mxu3 %v97_v12 }
  0x24   :  { %284 = vmatpush.msrb.mxu2 %v157_v60  ;;  %263 = vmatpush.msrb.mxu1 %v142_v62 }
  0x25   :  { %244 = vmatpush.msrb.mxu0 %v125_v61 }
  0x26   :  { %285 = vmatpush.msrb.mxu2 %v156_v0  ;;  %264 = vmatpush.msrb.mxu1 %v141_v2 }
  0x27   :  { %245 = vmatpush.msrb.mxu0 %v124_v1 }
  0x28   :  { %286 = vmatpush.msrb.mxu2 %v155_v4  ;;  %265 = vmatpush.msrb.mxu1 %v140_v6 }
  0x29   :  { %246 = vmatpush.msrb.mxu0 %v123_v5 }
  0x2a   :  { %287 = vmatpush.msrb.mxu2 %v154_v8  ;;  %266 = vmatpush.msrb.mxu1 %v139_v10 }
  0x2b   :  { %247 = vmatpush.msrb.mxu0 %v122_v9 }
  0x2c   :  { %19 = vsyncpa [#allocation5], 0  ;;  %288 = vmatpush.msrb.mxu2 %v153_v11  ;;  %v137_v18 = vld [vmem:[%s1486_s2 + $0x2d0] sm:$0xff]  ;;  %267 = vmatpush.msrb.mxu1 %v138_v14  ;;  %v151_v20 = vld [vmem:[%s1486_s2 + $0x340] sm:$0xff]  ;;  %vm312_vm0 = vcmask 261120   ;;  %vm336_vm1 = vcmask 64512  }
  0x2d   :  { %248 = vmatpush.msrb.mxu0 %v121_v13  ;;  %v42_v19 = vld [vmem:[%s1484_s0 + $0x10] sm:$0xff]  ;;  %v119_v21 = vld [vmem:[%s1486_s2 + $0x240] sm:$0xff]  ;;  %237 = vmatpush.msra.mxu3 %v96_v15  ;;  %v136_v22 = vld [vmem:[%s1486_s2 + $0x2c8] sm:$0xff]  ;;  %s889_s17 = smov 120   ;;  %s727_s26 = sshll.u32 %s1495_s11, 4  ;;  %s728_s26 = int_to_ptr.hbm [resolvable:$true] %s727_s26 }
  0x2e   :  { %289 = vmatpush.msrb.mxu2 %v152_v16  ;;  %v95_v23 = vld [vmem:[%s1486_s2 + $0x180] sm:$0xff]  ;;  %268 = vmatpush.msrb.mxu1 %v137_v18  ;;  %v150_v24 = vld [vmem:[%s1486_s2 + $0x338] sm:$0xff]  ;;  %v149_v28 = vld [vmem:[%s1486_s2 + $0x330] sm:$0xff]  ;;  %s890_s27 = smov [#allocation4]  }
  0x2f   :  { %249 = vmatpush.msrb.mxu0 %v120_v17  ;;  %v118_v25 = vld [vmem:[%s1486_s2 + $0x238] sm:$0xff]  ;;  %219 = vmatmul.f32.vlgmr.msra.gmra.mxu2 %v42_v19  ;;  %v135_v26 = vld [vmem:[%s1486_s2 + $0x2c0] sm:$0xff]  ;;  %v117_v29 = vld [vmem:[%s1486_s2 + $0x230] sm:$0xff]  ;;  %s725_s28 = sshll.u32 %s890_s27, 4  ;;  %s726_s28 = int_to_ptr.vmem [resolvable:$true] %s725_s28 }
  0x30   :  { %290 = vmatpush.msrb.mxu2 %v151_v20  ;;  %v40_v27 = vld [vmem:[%s1484_s0] sm:$0xff]  ;;  %269 = vmatpush.msrb.mxu1 %v136_v22  ;;  %v134_v30 = vld [vmem:[%s1486_s2 + $0x2b8] sm:$0xff]  ;;  %v148_v32 = vld [vmem:[%s1486_s2 + $0x328] sm:$0xff] }
  0x31   :  { %250 = vmatpush.msrb.mxu0 %v119_v21  ;;  %238 = vmatpush.msra.mxu3 %v95_v23  ;;  %v43_v31 = vld [vmem:[%s1484_s0 + $0x18] sm:$0xff]  ;;  %v116_v33 = vld [vmem:[%s1486_s2 + $0x228] sm:$0xff]  ;;  %v133_v34 = vld [vmem:[%s1486_s2 + $0x2b0] sm:$0xff] }
  0x32   :  { %291 = vmatpush.msrb.mxu2 %v150_v24  ;;  %270 = vmatpush.msrb.mxu1 %v135_v26  ;;  %v147_v35 = vld [vmem:[%s1486_s2 + $0x320] sm:$0xff]  ;;  %v132_v37 = vld [vmem:[%s1486_s2 + $0x2a8] sm:$0xff]  ;;  %v146_v38 = vld [vmem:[%s1486_s2 + $0x318] sm:$0xff] }
  0x33   :  { %251 = vmatpush.msrb.mxu0 %v118_v25  ;;  %v115_v36 = vld [vmem:[%s1486_s2 + $0x220] sm:$0xff]  ;;  %239 = vmatmul.f32.vlgmr.msra.gmra.mxu3 %v43_v31  ;;  %v114_v39 = vld [vmem:[%s1486_s2 + $0x218] sm:$0xff]  ;;  %v145_v41 = vld [vmem:[%s1486_s2 + $0x310] sm:$0xff] }
  0x34   :  { %179 = vmatmul.f32.vlgmr.msra.gmra.mxu0 %v40_v27  ;;  %292 = vmatpush.msrb.mxu2 %v149_v28  ;;  %v131_v40 = vld [vmem:[%s1486_s2 + $0x2a0] sm:$0xff]  ;;  %v41_v42 = vld [vmem:[%s1484_s0 + $0x8] sm:$0xff]  ;;  %v113_v43 = vld [vmem:[%s1486_s2 + $0x210] sm:$0xff] }
  0x35   :  { %252 = vmatpush.msrb.mxu0 %v117_v29  ;;  %271 = vmatpush.msrb.mxu1 %v134_v30  ;;  %v130_v44 = vld [vmem:[%s1486_s2 + $0x298] sm:$0xff]  ;;  %v144_v45 = vld [vmem:[%s1486_s2 + $0x308] sm:$0xff]  ;;  %v129_v47 = vld [vmem:[%s1486_s2 + $0x290] sm:$0xff] }
  0x36   :  { %293 = vmatpush.msrb.mxu2 %v148_v32  ;;  %199 = vmatmul.f32.vlgmr.msra.gmra.mxu1 %v41_v42  ;;  %v112_v46 = vld [vmem:[%s1486_s2 + $0x208] sm:$0xff]  ;;  %v143_v48 = vld [vmem:[%s1486_s2 + $0x300] sm:$0xff]  ;;  %v46_v49 = vld [vmem:[%s1484_s0 + $0x30] sm:$0xff] }
  0x37   :  { %253 = vmatpush.msrb.mxu0 %v116_v33  ;;  %272 = vmatpush.msrb.mxu1 %v133_v34  ;;  %v111_v50 = vld [vmem:[%s1486_s2 + $0x200] sm:$0xff]  ;;  %v128_v51 = vld [vmem:[%s1486_s2 + $0x288] sm:$0xff]  ;;  %v307_v55 = vld [vmem:[%s1488_s4 + $0x18] sm:$0xff] }
  0x38   :  { %294 = vmatpush.msrb.mxu2 %v147_v35  ;;  %v44_v52 = vld [vmem:[%s1484_s0 + $0x20] sm:$0xff]  ;;  %v45_v54 = vld [vmem:[%s1484_s0 + $0x28] sm:$0xff]  ;;  %328 = vmatpush.msrb.mxu3 %v307_v55  ;;  %v306_v56 = vld [vmem:[%s1488_s4 + $0x10] sm:$0xff] }
  0x39   :  { %254 = vmatpush.msrb.mxu0 %v115_v36  ;;  %273 = vmatpush.msrb.mxu1 %v132_v37  ;;  %v127_v53 = vld [vmem:[%s1486_s2 + $0x280] sm:$0xff]  ;;  %v305_v57 = vld [vmem:[%s1488_s4 + $0x8] sm:$0xff]  ;;  %v405_v24 = vld [vmem:[%s1492_s8 + $0xb8] sm:$0xff]  ;;  %s891_s2 = smov [#allocation6]  }
  0x3a   :  { %295 = vmatpush.msrb.mxu2 %v146_v38  ;;  %329 = vmatpush.msrb.mxu3 %v306_v56  ;;  %v304_v58 = vld [vmem:[%s1488_s4] sm:$0xff]  ;;  %v403_v23 = vld [vmem:[%s1492_s8 + $0xa8] sm:$0xff]  ;;  %v396_v27 = vld [vmem:[%s1492_s8 + $0x70] sm:$0xff]  ;;  %s736_s13 = sshll.u32 %s891_s2, 4  ;;  %s716_s4 = sshll.u32 %s1494_s10, 4  ;;  %s737_s13 = int_to_ptr.vmem [resolvable:$true] %s736_s13  ;;  %s717_s4 = int_to_ptr.hbm [resolvable:$true] %s716_s4 }
  0x3b   :  { %255 = vmatpush.msrb.mxu0 %v114_v39  ;;  %274 = vmatpush.msrb.mxu1 %v131_v40  ;;  %v776_v59 = vld [vmem:[%s1487_s3] ss:$0 sm:$0xff]  ;;  %v407_v26 = vld [vmem:[%s1492_s8 + $0xc8] sm:$0xff]  ;;  %v400_v30 = vld [vmem:[%s1492_s8 + $0x90] sm:$0xff] }
  0x3c   :  { %296 = vmatpush.msrb.mxu2 %v145_v41  ;;  %330 = vmatpush.msrb.mxu3 %v305_v57  ;;  %v353_v11 = vld [vmem:[%s1490_s6] sm:$0xff]  ;;  %v399_v29 = vld [vmem:[%s1492_s8 + $0x88] sm:$0xff]  ;;  %v389_v31 = vld [vmem:[%s1492_s8 + $0x38] sm:$0xff] }
  0x3d   :  { %256 = vmatpush.msrb.mxu0 %v113_v43  ;;  %275 = vmatpush.msrb.mxu1 %v130_v44  ;;  %v777_v12 = vld [vmem:[%s1489_s5] ss:$0 sm:$0xff]  ;;  %v391_v32 = vld [vmem:[%s1492_s8 + $0x48] sm:$0xff]  ;;  %v392_v33 = vld [vmem:[%s1492_s8 + $0x50] sm:$0xff] }
  0x3e   :  { %297 = vmatpush.msrb.mxu2 %v144_v45  ;;  %331 = vmatpush.msrb.mxu3 %v304_v58  ;;  %v343_v18 = vld [vmem:[%s1485_s1] sm:$0xff]  ;;  %v393_v34 = vld [vmem:[%s1492_s8 + $0x58] sm:$0xff]  ;;  %v384_v36 = vld [vmem:[%s1492_s8 + $0x10] sm:$0xff] }
  0x3f   :  { %257 = vmatpush.msrb.mxu0 %v112_v46  ;;  %276 = vmatpush.msrb.mxu1 %v129_v47  ;;  %v406_v25 = vld [vmem:[%s1492_s8 + $0xc0] sm:$0xff]  ;;  %v385_v37 = vld [vmem:[%s1492_s8 + $0x18] sm:$0xff]  ;;  %v404_v39 = vld [vmem:[%s1492_s8 + $0xb0] sm:$0xff] }
  0x40   :  { %298 = vmatpush.msrb.mxu2 %v143_v48  ;;  %376 = vmatpush.msra.mxu3 %v353_v11  ;;  %v398_v28 = vld [vmem:[%s1492_s8 + $0x80] sm:$0xff]  ;;  %v409_v40 = vld [vmem:[%s1492_s8 + $0xd8] sm:$0xff]  ;;  %v395_v44 = vld [vmem:[%s1492_s8 + $0x68] sm:$0xff] }
  0x41   :  { %299 = vmatmul.f32.vlgmr.msrb.gmra.mxu2 %v46_v49  ;;  %258 = vmatpush.msrb.mxu0 %v111_v50  ;;  %v382_v35 = vld [vmem:[%s1492_s8] sm:$0xff]  ;;  %v397_v41 = vld [vmem:[%s1492_s8 + $0x78] sm:$0xff]  ;;  %v383_v45 = vld [vmem:[%s1492_s8 + $0x8] sm:$0xff] }
  0x42   :  { %277 = vmatpush.msrb.mxu1 %v128_v51  ;;  %259 = vmatmul.f32.vlgmr.msrb.gmra.mxu0 %v44_v52  ;;  %v386_v38 = vld [vmem:[%s1492_s8 + $0x20] sm:$0xff]  ;;  %v388_v46 = vld [vmem:[%s1492_s8 + $0x30] sm:$0xff]  ;;  %v401_v52 = vld [vmem:[%s1492_s8 + $0x98] sm:$0xff] }
  0x43   :  { %481 = vmatpush.msra.mxu0 %v405_v24  ;;  %521 = vmatpush.msra.mxu2 %v407_v26  ;;  %v402_v42 = vld [vmem:[%s1492_s8 + $0xa0] sm:$0xff]  ;;  %v408_v51 = vld [vmem:[%s1492_s8 + $0xd0] sm:$0xff] }
  0x44   :  { %278 = vmatpush.msrb.mxu1 %v127_v53  ;;  %v390_v43 = vld [vmem:[%s1492_s8 + $0x40] sm:$0xff] }
  0x45   :  { %279 = vmatmul.f32.vlgmr.msrb.gmra.mxu1 %v45_v54  ;;  %482 = vmatpush.msra.mxu0 %v398_v28  ;;  %v778_v47 = vld [vmem:[%s1491_s7] ss:$0 sm:$0xff]  ;;  %v387_v54 = vld [vmem:[%s1492_s8 + $0x28] sm:$0xff] }
  0x46   :  { %501 = vmatpush.msra.mxu1 %v406_v25  ;;  %522 = vmatpush.msra.mxu2 %v400_v30  ;;  %v394_v53 = vld [vmem:[%s1492_s8 + $0x60] sm:$0xff]  ;;  %s738_s8 = sshll.u32 %s1496_s12, 4  ;;  %s739_s8 = int_to_ptr.hbm [resolvable:$true] %s738_s8 }
  0x47   :  { %483 = vmatpush.msra.mxu0 %v391_v32  ;;  %v410_v55 = vld [vmem:[%s1493_s9] sm:$0xff]  ;;  %s892_s9 = smov [#allocation2]  }
  0x48   :  { %502 = vmatpush.msra.mxu1 %v399_v29  ;;  %523 = vmatpush.msra.mxu2 %v393_v34  ;;  %v414_v56 = vperm.slane %v410_v55, 2  ;;  %v415_v57 = vperm.slane %v410_v55, 3  ;;  %v417_v26 = vperm.slane %v410_v55, 5  ;;  %s714_s11 = sshll.u32 %s892_s9, 4  ;;  %s715_s11 = int_to_ptr.vmem [resolvable:$true] %s714_s11 }
  0x49   :  { %484 = vmatpush.msra.mxu0 %v384_v36 }
  0x4a   :  { %503 = vmatpush.msra.mxu1 %v392_v33  ;;  %524 = vmatpush.msra.mxu2 %v386_v38 }
  0x4b   :  { %561 = vmatpush.msrb.mxu0 %v409_v40 }
  0x4c   :  { %504 = vmatpush.msra.mxu1 %v385_v37 }
  0x4d   :  { %562 = vmatpush.msrb.mxu0 %v402_v42 }
  0x4f   :  { %563 = vmatpush.msrb.mxu0 %v395_v44 }
  0x51   :  { %564 = vmatpush.msrb.mxu0 %v388_v46 }
  0xb1   :  { %v180_v60 = vpop.f32.mrf.mxu0 }
  0xb2   :  { %v181_v61 = vadd.f32 %v776_v59, %v180_v60  ;;  %v220_v63 = vpop.f32.mrf.mxu2 }
  0xb3   :  { %v200_v62 = vpop.f32.mrf.mxu1 }
  0xb4   :  { %v201_v0 = vadd.f32 %v200_v62, %v181_v61 }
  0xb6   :  { %v240_v1 = vpop.f32.mrf.mxu3  ;;  %v221_v2 = vadd.f32 %v220_v63, %v201_v0  ;;  %v412_v63 = vperm.slane %v410_v55, 0 }
  0xb8   :  { %v241_v3 = vadd.f32 %v240_v1, %v221_v2  ;;  %v416_v1 = vperm.slane %v410_v55, 4  ;;  %v418_v2 = vperm.slane %v410_v55, 6 }
  0xbf   :  { %v260_v4 = vpop.f32.mrf.mxu0 }
  0xc0   :  { %v261_v5 = vadd.f32 %v260_v4, %v241_v3 }
  0xc2   :  { %v280_v6 = vpop.f32.mrf.mxu1 }
  0xc3   :  { %v281_v7 = vadd.f32 %v280_v6, %v261_v5 }
  0xc4   :  { %v300_v8 = vpop.f32.mrf.mxu2 }
  0xc5   :  { %v301_v9 = vadd.f32 %v300_v8, %v281_v7 }
  0xc7   :  { %779 = vtanh.f32 %v301_v9 }
  0xcd   :  { %v780_v10 = vpop.eup %779 }
  0xce   :  { %756 = vmatmul.msk.f32.vlgmr.msrb.gmra.mxu3 %vm312_vm0, %v780_v10 }
  0xcf   :  { %441 = vmatpush.msrb.mxu3 %v403_v23 }
  0xd1   :  { %442 = vmatpush.msrb.mxu3 %v396_v27 }
  0xd3   :  { %443 = vmatpush.msrb.mxu3 %v389_v31 }
  0xd5   :  { %444 = vmatpush.msrb.mxu3 %v382_v35 }
 0x151   :  { %v333_v13 = vpop.f32.mrf.mxu3 }
 0x152   :  { %v334_v14 = vadd.f32 %v777_v12, %v333_v13 }
 0x154   :  { %v344_v15 = vmul.f32 0.5, %v334_v14  ;;  %337 = vst.msk [vmem:[#allocation4] sm:$0xff] %vm336_vm1, %v334_v14 }
 0x155   :  { %730 = dma.vmem_to_hbm [thread:$0]  %s726_s28, 128, %s728_s26, [#allocation5]  }
 0x156   :  { %v345_v16 = vmul.f32 1.442695, %v344_v15  ;;  %v413_v15 = vperm.slane %v410_v55, 1 }
 0x158   :  { %781 = vpow2.f32 %v345_v16 }
 0x15e   :  { %v782_v17 = vpop.eup %781 }
 0x15f   :  { %348 = vrot.lane.b32.xlu0 %v782_v17, %s889_s17 }
 0x167   :  { %339 = vrot.lane.b32.xlu0 %v334_v14, %s889_s17 }
 0x1d1   :  { %v349_v19 = vpop.permute.xlu0 %348 }
 0x1d2   :  { %v351_v20 = vmul.f32 %v349_v19, %v343_v18 }
 0x1d4   :  { %v352_v21 = vadd.f32 %v351_v20, %v334_v14 }
 0x1d6   :  { %757 = vmatmul.msk.f32.vlgmr.msra.gmra.mxu3 %vm336_vm1, %v352_v21 }
 0x1d7   :  { %461 = vmatpush.msra.mxu3 %v404_v39 }
 0x1d9   :  { %v340_v22 = vpop.permute.xlu0 %339  ;;  %462 = vmatpush.msra.mxu3 %v397_v41 }
 0x1da   :  { %342 = vst.msk [vmem:[#allocation6] sm:$0xff] %vm336_vm1, %v340_v22 }
 0x1db   :  { %463 = vmatpush.msra.mxu3 %v390_v43  ;;  %741 = dma.vmem_to_hbm [thread:$0]  %s737_s13, 128, %s739_s8, [#allocation5]  }
 0x1dd   :  { %464 = vmatpush.msra.mxu3 %v383_v45 }
 0x259   :  { %v378_v48 = vpop.f32.mrf.mxu3 }
 0x25a   :  { %v379_v49 = vadd.f32 %v778_v47, %v378_v48 }
 0x25c   :  { %783 = vtanh.f32 %v379_v49 }
 0x262   :  { %v784_v50 = vpop.eup %783 }
 0x263   :  { %758 = vmatmul.msk.f32.vlgmr.msrb.gmra.mxu3 %vm312_vm0, %v784_v50  ;;  %760 = vmatmul.msk.f32.vlgmr.msra.gmra.mxu0 %vm312_vm0, %v784_v50 }
 0x264   :  { %761 = vmatmul.msk.f32.vlgmr.msra.gmra.mxu1 %vm312_vm0, %v784_v50  ;;  %762 = vmatmul.msk.f32.vlgmr.msra.gmra.mxu2 %vm312_vm0, %v784_v50 }
 0x265   :  { %541 = vmatpush.msrb.mxu3 %v408_v51 }
 0x267   :  { %542 = vmatpush.msrb.mxu3 %v401_v52 }
 0x269   :  { %543 = vmatpush.msrb.mxu3 %v394_v53 }
 0x26b   :  { %759 = vmatmul.msk.f32.vlgmr.msra.gmra.mxu3 %vm312_vm0, %v784_v50  ;;  %764 = vmatmul.msk.f32.vlgmr.msrb.gmra.mxu0 %vm312_vm0, %v784_v50 }
 0x26c   :  { %544 = vmatpush.msrb.mxu3 %v387_v54 }
 0x273   :  { %763 = vmatmul.msk.f32.vlgmr.msrb.gmra.mxu3 %vm312_vm0, %v784_v50 }
 0x2e0   :  { %v486_v58 = vpop.f32.mrf.mxu0 }
 0x2e1   :  { %v487_v59 = vadd.f32 %v486_v58, %v414_v56  ;;  %v506_v60 = vpop.f32.mrf.mxu1 }
 0x2e2   :  { %v507_v61 = vadd.f32 %v506_v60, %v415_v57 }
 0x2e3   :  { %v767_v62 = vmul.f32 -1.442695, %v487_v59 }
 0x2e4   :  { %v768_v0 = vmul.f32 -1.442695, %v507_v61 }
 0x2e5   :  { %785 = vpow2.f32 %v767_v62 }
 0x2e6   :  { %787 = vpow2.f32 %v768_v0  ;;  %v446_v3 = vpop.f32.mrf.mxu3 }
 0x2e7   :  { %v447_v4 = vadd.f32 %v446_v3, %v412_v63  ;;  %v526_v5 = vpop.f32.mrf.mxu2 }
 0x2e8   :  { %v527_v6 = vadd.f32 %v526_v5, %v416_v1  ;;  %v566_v7 = vpop.f32.mrf.mxu0 }
 0x2e9   :  { %v765_v8 = vmul.f32 -1.442695, %v447_v4  ;;  %v567_v9 = vadd.f32 %v566_v7, %v418_v2 }
 0x2ea   :  { %v769_v10 = vmul.f32 -1.442695, %v527_v6 }
 0x2eb   :  { %v786_v11 = vpop.eup %785  ;;  %789 = vpow2.f32 %v765_v8  ;;  %v771_v12 = vmul.f32 -1.442695, %v567_v9 }
 0x2ec   :  { %v788_v13 = vpop.eup %787  ;;  %v592_v14 = vadd.f32 1.0, %v786_v11  ;;  %791 = vpow2.f32 %v769_v10 }
 0x2ed   :  { %v593_v16 = vadd.f32 1.0, %v788_v13  ;;  %793 = vpow2.f32 %v771_v12 }
 0x2ee   :  { %795 = vrcp.f32 %v592_v14  ;;  %v466_v17 = vpop.f32.mrf.mxu3  ;;  %v636_v29 = vand.u32 2147483647, %v592_v14  ;;  %v638_v30 = vand.u32 2147483648, %v592_v14  ;;  %vm632_vm2 = vweird.f32 %v592_v14 }
 0x2ef   :  { %797 = vrcp.f32 %v593_v16  ;;  %v467_v18 = vadd.f32 %v466_v17, %v413_v15  ;;  %v651_v32 = vand.u32 2147483647, %v593_v16  ;;  %v653_v35 = vand.u32 2147483648, %v593_v16 }
 0x2f0   :  { %vm647_vm3 = vweird.f32 %v593_v16  ;;  %vm1454_vm5 = vcmp.eq.f32.partialorder %v636_v29, 8.507059e+37  ;;  %v639_v42 = vor.u32 1.1754944e-38, %v638_v30 }
 0x2f1   :  { %v790_v19 = vpop.eup %789  ;;  %v766_v25 = vmul.f32 -1.442695, %v467_v18  ;;  %vm1459_vm7 = vcmp.eq.f32.partialorder %v651_v32, 8.507059e+37  ;;  %v654_v47 = vor.u32 1.1754944e-38, %v653_v35 }
 0x2f2   :  { %v792_v20 = vpop.eup %791  ;;  %v1446_v21 = vadd.f32 1.0, %v790_v19 }
 0x2f3   :  { %v794_v22 = vpop.eup %793  ;;  %v1448_v23 = vadd.f32 1.0, %v792_v20 }
 0x2f4   :  { %v796_v24 = vpop.eup %795  ;;  %799 = vrcp.f32 %v1446_v21  ;;  %v1452_v36 = vadd.f32 1.0, %v794_v22  ;;  %v606_v51 = vand.u32 2147483647, %v1446_v21  ;;  %v608_v52 = vand.u32 2147483648, %v1446_v21 }
 0x2f5   :  { %v798_v27 = vpop.eup %797  ;;  %v628_v28 = vmul.f32 %v796_v24, %v592_v14  ;;  %801 = vrcp.f32 %v1448_v23  ;;  %vm633_vm4 = vweird.f32 %v796_v24  ;;  %v666_v56 = vand.u32 2147483647, %v1448_v23 }
 0x2f6   :  { %v643_v31 = vmul.f32 %v798_v27, %v593_v16  ;;  %v546_v33 = vpop.f32.mrf.mxu3  ;;  %803 = vpow2.f32 %v766_v25  ;;  %vm648_vm6 = vweird.f32 %v798_v27  ;;  %vm634_vm8 = vmor %vm632_vm2, %vm633_vm4  ;;  %v668_v61 = vand.u32 2147483648, %v1448_v23 }
 0x2f7   :  { %v629_v34 = vsub.f32 1.0, %v628_v28  ;;  %v547_v38 = vadd.f32 %v546_v33, %v417_v26  ;;  %805 = vrcp.f32 %v1452_v36  ;;  %vm649_vm9 = vmor %vm647_vm3, %vm648_vm6  ;;  %vm602_vm11 = vweird.f32 %v1446_v21 }
 0x2f8   :  { %v644_v37 = vsub.f32 1.0, %v643_v31  ;;  %vm607_vm13 = vcmp.eq.f32.partialorder %v606_v51, 8.507059e+37  ;;  %vm662_vm14 = vweird.f32 %v1448_v23  ;;  %v609_v5 = vor.u32 1.1754944e-38, %v608_v52 }
 0x2f9   :  { %v630_v39 = vmul.f32 %v796_v24, %v629_v34  ;;  %v770_v49 = vmul.f32 -1.442695, %v547_v38  ;;  %vm667_vm0 = vcmp.eq.f32.partialorder %v666_v56, 8.507059e+37  ;;  %v669_v10 = vor.u32 1.1754944e-38, %v668_v61 }
 0x2fa   :  { %v800_v41 = vpop.eup %799  ;;  %v645_v43 = vmul.f32 %v798_v27, %v644_v37  ;;  %v696_v11 = vand.u32 2147483647, %v1452_v36  ;;  %v698_v12 = vand.u32 2147483648, %v1452_v36  ;;  %vm692_vm3 = vweird.f32 %v1452_v36 }
 0x2fb   :  { %v802_v45 = vpop.eup %801  ;;  %v631_v46 = vadd.f32 %v796_v24, %v630_v39  ;;  %v598_v48 = vmul.f32 %v800_v41, %v1446_v21  ;;  %807 = vpow2.f32 %v770_v49  ;;  %vm603_vm10 = vweird.f32 %v800_v41 }
 0x2fc   :  { %v646_v50 = vadd.f32 %v798_v27, %v645_v43  ;;  %v658_v53 = vmul.f32 %v802_v45, %v1448_v23  ;;  %v804_v57 = vpop.eup %803  ;;  %vm663_vm12 = vweird.f32 %v802_v45  ;;  %vm604_vm15 = vmor %vm602_vm11, %vm603_vm10  ;;  %v699_v20 = vor.u32 1.1754944e-38, %v698_v12 }
 0x2fd   :  { %v635_v54 = vsel %vm634_vm8, %v796_v24, %v631_v46  ;;  %v599_v55 = vsub.f32 1.0, %v598_v48  ;;  %v806_v62 = vpop.eup %805  ;;  %v591_v1 = vadd.f32 1.0, %v804_v57  ;;  %vm664_vm1 = vmor %vm662_vm14, %vm663_vm12 }
 0x2fe   :  { %v640_v58 = vsel %vm1454_vm5, %v639_v42, %v635_v54  ;;  %v650_v59 = vsel %vm649_vm9, %v798_v27, %v646_v50  ;;  %v659_v60 = vsub.f32 1.0, %v658_v53  ;;  %v688_v3 = vmul.f32 %v806_v62, %v1452_v36 }
 0x2ff   :  { %704 = vst [vmem:[#allocation2 + $0x10] sm:$0xff] %v640_v58  ;;  %v655_v63 = vsel %vm1459_vm7, %v654_v47, %v650_v59  ;;  %v600_v0 = vmul.f32 %v800_v41, %v599_v55  ;;  %809 = vrcp.f32 %v591_v1  ;;  %vm693_vm2 = vweird.f32 %v806_v62 }
 0x300   :  { %705 = vst [vmem:[#allocation2 + $0x18] sm:$0xff] %v655_v63  ;;  %v660_v2 = vmul.f32 %v802_v45, %v659_v60  ;;  %v689_v7 = vsub.f32 1.0, %v688_v3  ;;  %vm694_vm4 = vmor %vm692_vm3, %vm693_vm2  ;;  %vm697_vm5 = vcmp.eq.f32.partialorder %v696_v11, 8.507059e+37  ;;  %v623_v25 = vand.u32 2147483648, %v591_v1 }
 0x301   :  { %v601_v4 = vadd.f32 %v800_v41, %v600_v0  ;;  %v808_v8 = vpop.eup %807  ;;  %v621_v27 = vand.u32 2147483647, %v591_v1  ;;  %vm617_vm7 = vweird.f32 %v591_v1 }
 0x302   :  { %v661_v6 = vadd.f32 %v802_v45, %v660_v2  ;;  %v690_v15 = vmul.f32 %v806_v62, %v689_v7  ;;  %v595_v17 = vadd.f32 1.0, %v808_v8  ;;  %v624_v31 = vor.u32 1.1754944e-38, %v623_v25 }
 0x303   :  { %v605_v9 = vsel %vm604_vm15, %v800_v41, %v601_v4  ;;  %vm622_vm9 = vcmp.eq.f32.partialorder %v621_v27, 8.507059e+37 }
 0x304   :  { %v610_v13 = vsel %vm607_vm13, %v609_v5, %v605_v9  ;;  %v665_v14 = vsel %vm664_vm1, %v802_v45, %v661_v6  ;;  %v691_v18 = vadd.f32 %v806_v62, %v690_v15  ;;  %811 = vrcp.f32 %v595_v17 }
 0x305   :  { %702 = vst [vmem:[#allocation2] sm:$0xff] %v610_v13  ;;  %v670_v16 = vsel %vm667_vm0, %v669_v10, %v665_v14  ;;  %v810_v19 = vpop.eup %809  ;;  %v683_v35 = vand.u32 2147483648, %v595_v17  ;;  %v681_v37 = vand.u32 2147483647, %v595_v17  ;;  %vm677_vm11 = vweird.f32 %v595_v17 }
 0x306   :  { %706 = vst [vmem:[#allocation2 + $0x20] sm:$0xff] %v670_v16  ;;  %v695_v21 = vsel %vm694_vm4, %v806_v62, %v691_v18  ;;  %v613_v22 = vmul.f32 %v810_v19, %v591_v1  ;;  %vm618_vm6 = vweird.f32 %v810_v19 }
 0x307   :  { %v700_v23 = vsel %vm697_vm5, %v699_v20, %v695_v21  ;;  %vm619_vm8 = vmor %vm617_vm7, %vm618_vm6  ;;  %v684_v39 = vor.u32 1.1754944e-38, %v683_v35  ;;  %vm682_vm13 = vcmp.eq.f32.partialorder %v681_v37, 8.507059e+37 }
 0x308   :  { %708 = vst [vmem:[#allocation2 + $0x30] sm:$0xff] %v700_v23  ;;  %v614_v24 = vsub.f32 1.0, %v613_v22 }
 0x30a   :  { %v615_v26 = vmul.f32 %v810_v19, %v614_v24  ;;  %v812_v28 = vpop.eup %811 }
 0x30b   :  { %v673_v30 = vmul.f32 %v812_v28, %v595_v17  ;;  %vm678_vm10 = vweird.f32 %v812_v28 }
 0x30c   :  { %v616_v29 = vadd.f32 %v810_v19, %v615_v26  ;;  %vm679_vm12 = vmor %vm677_vm11, %vm678_vm10 }
 0x30d   :  { %v674_v33 = vsub.f32 1.0, %v673_v30 }
 0x30e   :  { %v620_v32 = vsel %vm619_vm8, %v810_v19, %v616_v29 }
 0x30f   :  { %v625_v34 = vsel %vm622_vm9, %v624_v31, %v620_v32  ;;  %v675_v36 = vmul.f32 %v812_v28, %v674_v33 }
 0x310   :  { %703 = vst [vmem:[#allocation2 + $0x8] sm:$0xff] %v625_v34 }
 0x311   :  { %v676_v38 = vadd.f32 %v812_v28, %v675_v36 }
 0x313   :  { %v680_v40 = vsel %vm679_vm12, %v812_v28, %v676_v38 }
 0x314   :  { %v685_v41 = vsel %vm682_vm13, %v684_v39, %v680_v40 }
 0x315   :  { %707 = vst [vmem:[#allocation2 + $0x28] sm:$0xff] %v685_v41 }
 0x316   :  { %719 = dma.vmem_to_hbm [thread:$0]  %s715_s11, 896, %s717_s4, [#allocation3]  }
 0x317   :  { %885 = dma.done.wait [#allocation3], 896  }
 0x318   :  { %886 = vsyncadd [#allocation3], 4294966400 }
 0x319   :  { %887 = dma.done.wait [#allocation5], 256  }
 0x31a   :  { %888 = vsyncadd [#allocation5], 4294967040 }
 0x31b   :  { %754 = vsyncpa [#allocation3], 1 }
 0x31c   :  { %755 = vsyncpa [#allocation5], 1 }

</bundles_post_ra>
